<compile_context>
chip_gen: v7x
topology: tpu7x:2x2x1
jax: 0.10.0
libtpu: 0.0.40
codegen_flags: <defaults>
</compile_context>

<pallas_src>
import functools

import jax
import jax.numpy as jnp
import numpy as np
from jax.experimental import pallas as pl
from jax.experimental.pallas import tpu as pltpu


# ---------------------------------------------------------------------------
# Kernels
# ---------------------------------------------------------------------------

def _pair_neighbours(xf):
    """Circular lane neighbours: up[i] = x[i+1], dn[i] = x[i-1] (XLU rolls)."""
    e = xf.shape[-1]
    nbr_up = pltpu.roll(xf, shift=e - 1, axis=2)   # lane i <- x[i+1]
    nbr_dn = pltpu.roll(xf, shift=1, axis=2)       # lane i <- x[i-1]
    return nbr_up, nbr_dn


def _rope_table_kernel(x_ref, cos_ref, se_ref, so_ref, o_ref):
    # x_ref: (tb, TL, E).  cos/se/so refs: (1, TL, E) batch-invariant tables
    # stored in x.dtype (upcast here).  No transcendentals, no selects.
    xf = x_ref[...].astype(jnp.float32)
    nbr_up, nbr_dn = _pair_neighbours(xf)
    y = (xf * cos_ref[...].astype(jnp.float32)
         + nbr_up * se_ref[...].astype(jnp.float32)
         + nbr_dn * so_ref[...].astype(jnp.float32))
    o_ref[...] = y.astype(o_ref.dtype)


def _rope_timestep_kernel(ts_ref, invf_ref, mask_ref, x_ref, o_ref):
    # ts_ref: (tb, TL, 1) f32.  invf_ref: (1, 1, E) sign-folded, pairwise-
    # repeated 1/freq (even lanes negated).  mask_ref: (1, 1, E) even-lane mask.
    ang = ts_ref[...] * invf_ref[...]          # (tb, TL, E), signed angle
    cos = jnp.cos(ang)                         # cos(-a) == cos(a)
    sin = jnp.sin(ang)                         # already the signed sin
    sin_even = sin * mask_ref[...]
    sin_odd = sin - sin_even
    xf = x_ref[...].astype(jnp.float32)
    nbr_up, nbr_dn = _pair_neighbours(xf)
    o_ref[...] = (xf * cos + nbr_up * sin_even + nbr_dn * sin_odd).astype(o_ref.dtype)
    # TODO(synk): for E >= 256, compute ang/sin/cos at E/2 lane width and
    # pair-expand with one XLU interleave to halve redundant EUP work.


# ---------------------------------------------------------------------------
# Wrapper-side helpers (cached tables, tile sizing)
# ---------------------------------------------------------------------------

def _vmem_budget_bytes():
    """Generation-aware working-set budget; also used as vmem_limit_bytes."""
    cap = 64 * 1024 * 1024
    try:
        cap = int(pltpu.get_tpu_info().vmem_capacity_bytes)
    except Exception:
        pass
    # ~half of physical VMEM: 64 MiB on v5e/v6e (128 MiB phys), 32 MiB on v7x.
    return max(16 * 1024 * 1024, min(cap // 2, 64 * 1024 * 1024))


def _pick_block(B, L, E, x_itemsize, ts_itemsize, n_tables, tbl_itemsize, budget):
    """Choose (tb, tile_l): biggest lane-dense block that fits the VMEM budget."""
    per_b_row = E * 2 * x_itemsize + ts_itemsize       # x in + out (+ timestep)
    shared_row = n_tables * E * tbl_itemsize            # batch-invariant tables
    x_block_cap = 4 * 1024 * 1024                        # per-buffer x block cap

    def fits(tb, tl):
        ws = 2 * tl * (tb * per_b_row + shared_row)      # double-buffered set
        return ws <= budget and tb * tl * E * x_itemsize <= x_block_cap

    # Largest tile_l (full L, else a multiple of 8) that fits with tb = 1.
    tile_l = L
    if not fits(1, tile_l):
        tile_l = max(8, (L // 8) * 8)
        while tile_l > 8 and not fits(1, tile_l):
            tile_l = max(8, ((tile_l // 2) // 8) * 8)

    # Fold batch: largest divisor of B that still fits.
    tb = 1
    for d in range(B, 0, -1):
        if B % d == 0 and fits(d, tile_l):
            tb = d
            break

    # Megacore (2 TCs on v7x): keep >= 2 grid steps on the parallel axes.
    n_steps = (-(-L // tile_l)) * (B // tb)
    if n_steps < 2:
        if tb > 1:
            tb = max(d for d in range(1, tb) if B % d == 0)
        elif L >= 16 and tile_l == L:
            tile_l = max(8, ((-(-L // 2) + 7) // 8) * 8)
    return tb, tile_l


@functools.lru_cache(maxsize=16)
def _rope_tables(L, E, base, dtype_name):
    """Batch-invariant tables for timestep=None; cached across calls."""
    pos = np.arange(L, dtype=np.float32)[:, None]                          # (L, 1)
    freq = np.power(float(base),
                    np.arange(0, E, 2, dtype=np.float32) / np.float32(E)
                    ).astype(np.float32)                                   # (E/2,)
    ang = pos / freq                                                       # (L, E/2)
    cos = np.cos(ang).astype(np.float32)
    sin = np.sin(ang).astype(np.float32)
    cos_rep = np.repeat(cos, 2, axis=-1)                                   # (L, E)
    sin_even = np.zeros((L, E), np.float32)
    sin_even[:, 0::2] = -sin
    sin_odd = np.zeros((L, E), np.float32)
    sin_odd[:, 1::2] = sin
    dt = jnp.dtype(dtype_name)
    to_tbl = lambda a: jnp.asarray(a.reshape(1, L, E), dtype=dt)
    return to_tbl(cos_rep), to_tbl(sin_even), to_tbl(sin_odd)


@functools.lru_cache(maxsize=16)
def _rope_timestep_consts(E, base):
    """Sign-folded pairwise-repeated 1/freq and even-lane mask; cached."""
    inv = (1.0 / np.power(float(base),
                          np.arange(0, E, 2, dtype=np.float32) / np.float32(E))
           ).astype(np.float32)
    inv_rep = np.repeat(inv, 2)
    inv_rep[0::2] *= -1.0            # fold the sin sign: sin(-a) = -sin(a)
    mask = np.zeros((E,), np.float32)
    mask[0::2] = 1.0
    return (jnp.asarray(inv_rep.reshape(1, 1, E), jnp.float32),
            jnp.asarray(mask.reshape(1, 1, E), jnp.float32))


# ---------------------------------------------------------------------------
# Public entry point
# ---------------------------------------------------------------------------

def rotary_pos_embedding(x, timestep=None, base=10000):
    """Pallas TPU implementation of RotaryPosEmbedding.forward (interleaved RoPE).

    x: (B, L, E) with E even.  For best performance keep E a multiple of 128
    (lane-dense stores); for per-head RoPE fold heads into the last dim.
    Note: timesteps > 2**24 lose precision in the f32 cast (matches reference).
    """
    B, L, E = x.shape
    assert E % 2 == 0, "embed dim must be even"
    x_dt = jnp.dtype(x.dtype)
    budget = _vmem_budget_bytes()
    out_shape = jax.ShapeDtypeStruct((B, L, E), x.dtype)
    cparams = pltpu.CompilerParams(
        dimension_semantics=("parallel", "parallel"),
        vmem_limit_bytes=budget,
    )

    if timestep is None:
        # Default timesteps (arange(L) for every batch): angles are batch-
        # invariant; use cached, pre-masked/pre-signed tables in x.dtype.
        cos_rep, sin_even, sin_odd = _rope_tables(L, E, int(base), x_dt.name)
        tb, tile_l = _pick_block(B, L, E, x_dt.itemsize, 0, 3, x_dt.itemsize, budget)
        grid = (pl.cdiv(L, tile_l), B // tb)   # B innermost: table block stays resident
        x_spec = pl.BlockSpec((tb, tile_l, E), lambda l, b: (b, l, 0))
        tbl_spec = pl.BlockSpec((1, tile_l, E), lambda l, b: (0, l, 0))
        return pl.pallas_call(
            _rope_table_kernel,
            out_shape=out_shape,
            grid_spec=pltpu.PrefetchScalarGridSpec(
                num_scalar_prefetch=0,
                grid=grid,
                in_specs=[x_spec, tbl_spec, tbl_spec, tbl_spec],
                out_specs=x_spec,
            ),
            compiler_params=cparams,
        )(x, cos_rep, sin_even, sin_odd)

    # Explicit (possibly per-batch) timesteps: angles genuinely differ per
    # batch, so sin/cos are computed in-kernel from the sign-folded inv_freq.
    timestep = jnp.asarray(timestep)
    if timestep.ndim == 1:
        timestep = jnp.broadcast_to(timestep, (B, L))
    assert timestep.shape == (B, L), "timestep must have shape (B, L) or (L,)"
    ts = timestep.astype(jnp.float32).reshape(B, L, 1)
    invf_signed, even_mask = _rope_timestep_consts(E, int(base))

    tb, tile_l = _pick_block(B, L, E, x_dt.itemsize, 4, 0, 4, budget)
    grid = (pl.cdiv(L, tile_l), B // tb)
    x_spec = pl.BlockSpec((tb, tile_l, E), lambda l, b: (b, l, 0))
    ts_spec = pl.BlockSpec((tb, tile_l, 1), lambda l, b: (b, l, 0))
    const_spec = pl.BlockSpec((1, 1, E), lambda l, b: (0, 0, 0))   # VMEM-resident
    return pl.pallas_call(
        _rope_timestep_kernel,
        out_shape=out_shape,
        grid_spec=pltpu.PrefetchScalarGridSpec(
            num_scalar_prefetch=0,
            grid=grid,
            in_specs=[ts_spec, const_spec, const_spec, x_spec],
            out_specs=x_spec,
        ),
        compiler_params=cparams,
    )(ts, invf_signed, even_mask, x)


# ---------------------------------------------------------------------------
# Pure-JAX reference (matches the PyTorch forward)
# ---------------------------------------------------------------------------

def _reference(x, timestep=None, base=10000):
    B, L, E = x.shape
    if timestep is None:
        timestep = jnp.broadcast_to(jnp.arange(L), (B, L))
    ts = timestep.astype(jnp.float32)[..., None]                     # (B, L, 1)
    freq = base ** (jnp.arange(0, E, 2, dtype=jnp.float32) / E)      # (E/2,)
    sin = jnp.sin(ts / freq)
    cos = jnp.cos(ts / freq)
    x1, x2 = x[..., 0::2], x[..., 1::2]
    return jnp.stack([x1 * cos - x2 * sin, x1 * sin + x2 * cos],
                     axis=-1).reshape(B, L, E)


if __name__ == "__main__":
    B, L, E = 2, 8, 128   # E=128 keeps the output lane-dense (full vreg width)
    key = jax.random.PRNGKey(0)
    x = jax.random.normal(key, (B, L, E), dtype=jnp.float32)

    # Default path (timestep=None -> arange(L) per batch, table kernel).
    out = jax.block_until_ready(rotary_pos_embedding(x))
    np.testing.assert_allclose(np.asarray(out), np.asarray(_reference(x)),
                               rtol=1e-5, atol=1e-5)

    # Explicit per-batch timestep path (in-kernel sin/cos kernel).
    ts = jnp.stack([jnp.arange(L), jnp.arange(L) + 3]).astype(jnp.float32)
    out2 = jax.block_until_ready(rotary_pos_embedding(x, timestep=ts))
    np.testing.assert_allclose(np.asarray(out2),
                               np.asarray(_reference(x, timestep=ts)),
                               rtol=1e-5, atol=1e-5)

    print("KERNEL_OK")
</pallas_src>

<mosaic_0001>
module attributes {stable_mosaic.version = 11 : i64} {
  func.func @_rope_table_kernel(%arg0: i32, %arg1: i32, %arg2: memref<1x8x128xf32, #tpu.memory_space<vmem>>, %arg3: memref<1x8x128xf32, #tpu.memory_space<vmem>>, %arg4: memref<1x8x128xf32, #tpu.memory_space<vmem>>, %arg5: memref<1x8x128xf32, #tpu.memory_space<vmem>>, %arg6: memref<1x8x128xf32, #tpu.memory_space<vmem>>) attributes {dimension_semantics = [#tpu.dimension_semantics<parallel>, #tpu.dimension_semantics<parallel>], iteration_bounds = array<i64: 1, 2>, scalar_prefetch = 0 : i64, scratch_operands = 0 : i64, tpu.core_type = #tpu.core_type<tc>, window_params = [{transform_indices = @transform_0, window_bounds = array<i64: 1, 8, 128>}, {transform_indices = @transform_1, window_bounds = array<i64: 1, 8, 128>}, {transform_indices = @transform_2, window_bounds = array<i64: 1, 8, 128>}, {transform_indices = @transform_3, window_bounds = array<i64: 1, 8, 128>}, {transform_indices = @transform_4, window_bounds = array<i64: 1, 8, 128>}]} {
    %c0 = arith.constant 0 : index
    %c0_0 = arith.constant 0 : index
    %c0_1 = arith.constant 0 : index
    %0 = vector.load %arg2[%c0, %c0_0, %c0_1] : memref<1x8x128xf32, #tpu.memory_space<vmem>>, vector<1x8x128xf32>
    %c127_i32 = arith.constant 127 : i32
    %1 = tpu.dynamic_rotate %0 by %c127_i32 dim 2 : vector<1x8x128xf32>, i32 -> vector<1x8x128xf32>
    %c1_i32 = arith.constant 1 : i32
    %2 = tpu.dynamic_rotate %0 by %c1_i32 dim 2 : vector<1x8x128xf32>, i32 -> vector<1x8x128xf32>
    %c0_2 = arith.constant 0 : index
    %c0_3 = arith.constant 0 : index
    %c0_4 = arith.constant 0 : index
    %3 = vector.load %arg3[%c0_2, %c0_3, %c0_4] : memref<1x8x128xf32, #tpu.memory_space<vmem>>, vector<1x8x128xf32>
    %4 = arith.mulf %0, %3 : vector<1x8x128xf32>
    %c0_5 = arith.constant 0 : index
    %c0_6 = arith.constant 0 : index
    %c0_7 = arith.constant 0 : index
    %5 = vector.load %arg4[%c0_5, %c0_6, %c0_7] : memref<1x8x128xf32, #tpu.memory_space<vmem>>, vector<1x8x128xf32>
    %6 = arith.mulf %1, %5 : vector<1x8x128xf32>
    %7 = arith.addf %4, %6 : vector<1x8x128xf32>
    %c0_8 = arith.constant 0 : index
    %c0_9 = arith.constant 0 : index
    %c0_10 = arith.constant 0 : index
    %8 = vector.load %arg5[%c0_8, %c0_9, %c0_10] : memref<1x8x128xf32, #tpu.memory_space<vmem>>, vector<1x8x128xf32>
    %9 = arith.mulf %2, %8 : vector<1x8x128xf32>
    %10 = arith.addf %7, %9 : vector<1x8x128xf32>
    %c0_11 = arith.constant 0 : index
    %c0_12 = arith.constant 0 : index
    %c0_13 = arith.constant 0 : index
    %11 = vector.load %arg6[%c0_11, %c0_12, %c0_13] : memref<1x8x128xf32, #tpu.memory_space<vmem>>, vector<1x8x128xf32>
    tpu.vector_store %arg6[%c0_11, %c0_12, %c0_13], %10 {strides = array<i32>} : memref<1x8x128xf32, #tpu.memory_space<vmem>>, vector<1x8x128xf32>,
    return
  }
  func.func @transform_0(%arg0: i32, %arg1: i32) -> (i32, i32, i32) {
    %c0_i32 = arith.constant 0 : i32
    %c0_i32_0 = arith.constant 0 : i32
    return %arg1, %arg0, %c0_i32 : i32, i32, i32
  }
  func.func @transform_1(%arg0: i32, %arg1: i32) -> (i32, i32, i32) {
    %c0_i32 = arith.constant 0 : i32
    %c0_i32_0 = arith.constant 0 : i32
    %c0_i32_1 = arith.constant 0 : i32
    return %c0_i32, %arg0, %c0_i32_0 : i32, i32, i32
  }
  func.func @transform_2(%arg0: i32, %arg1: i32) -> (i32, i32, i32) {
    %c0_i32 = arith.constant 0 : i32
    %c0_i32_0 = arith.constant 0 : i32
    %c0_i32_1 = arith.constant 0 : i32
    return %c0_i32, %arg0, %c0_i32_0 : i32, i32, i32
  }
  func.func @transform_3(%arg0: i32, %arg1: i32) -> (i32, i32, i32) {
    %c0_i32 = arith.constant 0 : i32
    %c0_i32_0 = arith.constant 0 : i32
    %c0_i32_1 = arith.constant 0 : i32
    return %c0_i32, %arg0, %c0_i32_0 : i32, i32, i32
  }
  func.func @transform_4(%arg0: i32, %arg1: i32) -> (i32, i32, i32) {
    %c0_i32 = arith.constant 0 : i32
    %c0_i32_0 = arith.constant 0 : i32
    return %arg1, %arg0, %c0_i32 : i32, i32, i32
  }
}

</mosaic_0001>

<bundles_post_ra>
// kernel: tpu_custom_call.1
= control target key start
LH: loop header
LB: loop body
LE: loop exit
PB: predicated region body
PF: predicated region fallthrough
CT: control target
= control target key end

     0   :  { %9 = vsyncpa [#allocation3], 0  ;;  %s987_s0 = inlined_call_operand.hbm [shape: f32[2,8,128], index: 0, kind: input, shape index: {}]   ;;  %s988_s1 = inlined_call_operand.hbm [shape: f32[1,8,128], index: 1, kind: input, shape index: {}]   ;;  %s989_s2 = inlined_call_operand.hbm [shape: f32[1,8,128], index: 2, kind: input, shape index: {}]   ;;  %s990_s3 = inlined_call_operand.vmem [shape: f32[1,8,128], index: 3, kind: input, shape index: {}]   ;;  %s991_s4 = inlined_call_operand.hbm [shape: f32[2,8,128], index: 4, kind: output, shape index: {}]  }
   0x1   :  { %11 = vsyncpa [#allocation3 + $0x1], 0 }
   0x2   :  { %12 = vsyncpa [#allocation6], 0 }
   0x3   :  { %13 = vsyncpa [#allocation4], 0 }
   0x4   :  { %15 = vsyncpa [#allocation4 + $0x1], 0  ;;  %s741_s15 = smov 0   ;;  %s743_s16 = smov 0  }
   0x5   :  { %s745_s17 = smov 0   ;;  %s747_s18 = smov 0  }
   0x6   :  { %s749_s19 = smov 0   ;;  %s751_s20 = smov 0  }
   0x7 LB: > { %s433_s21 = sadd.s32 4294967295, %s708_s20   ;;  %s434_s22 = sadd.s32 4294967294, %s708_s20   ;;  %s708_s20 = sphi %s751_s20, %s21_s20   ;;  %s704_s19 = sphi %s749_s19, %s1014_s19   ;;  %s700_s18 = sphi %s747_s18, %s1013_s18   ;;  %s696_s17 = sphi %s745_s17, %s1012_s17   ;;  %s692_s16 = sphi %s743_s16, %s1011_s16   ;;  %s688_s15 = sphi %s741_s15, %s1010_s15  }
   0x8   : > { %p55_p0 = scmp.ne.s32.totalorder %s692_s16, %s688_s15  ;;  %p775_p1 = scmp.eq.s32.totalorder %s433_s21, 0 }
   0x9   : > { %p779_p2 = scmp.eq.s32.totalorder %s433_s21, 1  ;;  %p165_p3 = scmp.eq.s32.totalorder %s434_s22, 1 }
   0xa   : > { %s996_s23 = scalar_select %p775_p1, 1, 0 }
   0xb   : > { %s997_s24 = scalar_select %p779_p2, 1, 0 }
   0xc   : > { %p785_p4 = por %p775_p1, %p55_p0  ;;  %p435_p5 = scmp.ge.s32.totalorder %s708_s20, 1 }
   0xd   : > { %p790_p6 = por %p165_p3, %p55_p0  ;;  %p172_p7 = scmp.lt.s32.totalorder %s708_s20, 3 }
   0xe   : > { %s998_s25 = scalar_select %p785_p4, 1, 0 }
   0xf   : > { %s999_s26 = scalar_select %p790_p6, 1, 0 }
  0x10   : > { %p795_p8 = pnand %p435_p5, %p172_p7  ;;  %s710_s28 = smov [#allocation5]  }
  0x11   : > { %s187_s29 = sshll.u32 %s710_s28, 4  ;;  %s711_s30 = smov [#allocation7]   ;;  %s188_s29 = int_to_ptr.vmem [resolvable:$true] %s187_s29 }
  0x12   : > { %s1000_s27 = scalar_select %p795_p8, 1, 0 }
  0x13   : > { %p463_p10 = pneg %p795_p8  ;;  %s200_s5 = sshll.u32 %s711_s30, 4  ;;  %s808_s5 = int_to_ptr.vmem [resolvable:$true] %s200_s5 }
  0x14   : > { %s536_s9 = scalar_lea.hbm %s988_s1, 128 }
  0x15   : > { %p804_p11 = pnand %p463_p10, %p775_p1  ;;  %p537_p12 = scmp.ne.s32.totalorder %s988_s1, %s536_s9 }
  0x16   : > { %p543_p5 = scmp.lt.u32.totalorder %s536_s9, %s988_s1 }
  0x17   : > { %p538_p13 = pneg %p804_p11 }
  0x19   : > { %p539_p0 = pnand %p538_p13, %p537_p12 }
  0x1b   : > { %p540_p3 = pneg %p539_p0 }
  0x1d   : > { %p545_p7 = pnand %p543_p5, %p540_p3 }
  0x1f   : > { %548 = shalt.err (!%p545_p7)
}
  0x20   : > { %s549_s14 = scalar_lea.vmem %s188_s29, 128  ;;  %p557_p1 = scmp.lt.s32.totalorder %s188_s29, %s188_s29 }
  0x21   : > { %p550_p10 = scmp.ne.s32.totalorder %s188_s29, %s549_s14  ;;  %p558_p4 = scmp.lt.s32.totalorder %s549_s14, %s549_s14 }
  0x23   : > { %p552_p9 = pnand %p550_p10, %p538_p13  ;;  %p559_p8 = por %p558_p4, %p557_p1 }
  0x25   : > { %p553_p6 = pneg %p552_p9 }
  0x27   : > { %p560_p2 = pnand %p559_p8, %p553_p6 }
  0x29   : > { %563 = shalt.err (!%p560_p2)
}
  0x2a   : > { %466 = dma.hbm_to_vmem [thread:$0]  (!%p804_p11), %s988_s1, 128, %s188_s29, [#allocation6]  }
  0x2b   : > { %s564_s7 = scalar_lea.hbm %s989_s2, 128 }
  0x2c   : > { %p565_p9 = scmp.ne.s32.totalorder %s989_s2, %s564_s7  ;;  %p571_p2 = scmp.lt.u32.totalorder %s564_s7, %s989_s2 }
  0x2e   : > { %p567_p1 = pnand %p565_p9, %p538_p13 }
  0x30   : > { %p568_p4 = pneg %p567_p1 }
  0x32   : > { %p573_p6 = pnand %p571_p2, %p568_p4 }
  0x34   : > { %576 = shalt.err (!%p573_p6)
}
  0x35   : > { %s577_s29 = scalar_lea.vmem %s808_s5, 128  ;;  %p585_p3 = scmp.lt.s32.totalorder %s808_s5, %s808_s5 }
  0x36   : > { %p578_p8 = scmp.ne.s32.totalorder %s808_s5, %s577_s29  ;;  %p586_p5 = scmp.lt.s32.totalorder %s577_s29, %s577_s29 }
  0x38   : > { %p580_p12 = pnand %p578_p8, %p538_p13  ;;  %p587_p7 = por %p586_p5, %p585_p3 }
  0x3a   : > { %p581_p0 = pneg %p580_p12 }
  0x3c   : > { %p588_p10 = pnand %p587_p7, %p581_p0 }
  0x3e   : > { %591 = shalt.err (!%p588_p10)
}
  0x3f   : > { %469 = dma.hbm_to_vmem [thread:$0]  (!%p804_p11), %s989_s2, 128, %s808_s5, [#allocation6]  }
  0x40   : > { %s30_s14 = sadd.s32 1, %s704_s19  ;;  %s42_s21 = sadd.s32 1, %s696_s17 }
  0x41   : > { %p31_p13 = scmp.ge.s32.totalorder %s30_s14, 2  ;;  %p49_p9 = scmp.ne.s32.totalorder %s696_s17, %s692_s16 }
  0x42   : > { %p50_p1 = scmp.eq.s32.totalorder %s708_s20, 0  ;;  %p480_p4 = scmp.lt.s32.totalorder %s708_s20, 2 }
  0x43   : > { %s1016_s14 = smov (%p31_p13, %s30_s14), 0  ;;  %p1002_p6 = scmp.ne.s32.totalorder %s997_s24, 0 }
  0x44   : > { %p51_p2 = por %p50_p1, %p49_p9  ;;  %s37_s22 = ssub.s32 %s704_s19, %s1016_s14 }
  0x45   : > { %p867_p8 = por %p1002_p6, %p49_p9  ;;  %s218_s28 = sand.u32 1, %s696_s17  }
  0x46   : > { %p40_p12 = scmp.eq.s32.totalorder %s37_s22, 0  ;;  %s440_s5 = sshll.u32 %s218_s28, 3 }
  0x47   : > { %s441_s30 = sshll.u32 %s704_s19, 7  ;;  %s222_s24 = scalar_lea.vmem [#allocation2], %s440_s5 }
  0x48   : > { %s876_s7 = scalar_select %p40_p12, %s696_s17, %s42_s21  }
  0x49   : > { %s881_s10 = scalar_lea.hbm %s987_s0, %s441_s30  ;;  %s230_s11 = sshll.u32 %s222_s24, 4  ;;  %s889_s11 = int_to_ptr.vmem [resolvable:$true] %s230_s11 }
  0x4a   : > { %p885_p11 = pnand %p480_p4, %p51_p2  ;;  %s219_s12 = scalar_lea.sflag [#allocation3], %s218_s28 }
  0x4b   : > { %s592_s13 = scalar_lea.hbm %s881_s10, 128  ;;  %s597_s5 = scalar_lea.hbm %s987_s0, 256 }
  0x4c   : > { %p593_p0 = scmp.ne.s32.totalorder %s881_s10, %s592_s13  ;;  %p594_p3 = pneg %p885_p11 }
  0x4d   : > { %p598_p10 = scmp.lt.u32.totalorder %s881_s10, %s987_s0  ;;  %p599_p13 = scmp.lt.u32.totalorder %s597_s5, %s592_s13 }
  0x4e   : > { %p595_p5 = pnand %p594_p3, %p593_p0  ;;  %p601_p1 = scmp.lt.u32.totalorder %s592_s13, %s881_s10 }
  0x4f   : > { %p600_p9 = por %p599_p13, %p598_p10 }
  0x50   : > { %p596_p7 = pneg %p595_p5 }
  0x51   : > { %p602_p4 = por %p601_p1, %p600_p9 }
  0x53   : > { %p603_p2 = pnand %p602_p4, %p596_p7 }
  0x55   : > { %606 = shalt.err (!%p603_p2)
}
  0x56   : > { %s607_s28 = scalar_lea.vmem %s889_s11, 128  ;;  %s712_s9 = smov [#allocation2]  }
  0x57   : > { %p608_p6 = scmp.ne.s32.totalorder %s889_s11, %s607_s28  ;;  %s612_s24 = sshll.u32 %s712_s9, 4  ;;  %s613_s24 = int_to_ptr.vmem [resolvable:$false] %s612_s24 }
  0x58   : > { %s614_s21 = scalar_lea.vmem %s613_s24, 256  ;;  %p615_p5 = scmp.lt.s32.totalorder %s889_s11, %s613_s24 }
  0x59   : > { %p610_p12 = pnand %p608_p6, %p594_p3  ;;  %p616_p10 = scmp.lt.s32.totalorder %s614_s21, %s607_s28 }
  0x5b   : > { %p611_p0 = pneg %p610_p12  ;;  %p617_p13 = por %p616_p10, %p615_p5 }
  0x5d   : > { %p618_p9 = pnand %p617_p13, %p611_p0 }
  0x5f   : > { %621 = shalt.err (!%p618_p9)
}
  0x60   : > { %473 = dma.hbm_to_vmem [thread:$0]  (!%p885_p11), %s881_s10, 128, %s889_s11, %s219_s12  }
  0x61   : > { %p1005_p7 = scmp.ne.s32.totalorder %s1000_s27, 0 }
  0x62   : > { %s919_s13 = sand.u32 (!%p1005_p7), 1, %s692_s16   ;;  %p1006_p3 = scmp.ne.s32.totalorder (!%p1005_p7), %s998_s25, 0 }
  0x63   : > { %239 = sbr.rel (%p1005_p7) target bundleno = 248 (0xf8), region = 36  ;;  %s443_s22 = sshll.u32 (!%p1005_p7), %s919_s13, 3 }
  0x64   : > { %s242_s5 = scalar_lea.sflag (!%p1005_p7), [#allocation3], %s919_s13  ;;  %s245_s30 = scalar_lea.vmem (!%p1005_p7), [#allocation2], %s443_s22 }
  0x6a   : > { %675 = dma.done.wait (%p1006_p3), %s242_s5, 128  }
  0x6b   : > { %677 = vsyncadd (%p1006_p3), %s242_s5, 4294967168  ;;  %p1007_p1 = scmp.ne.s32.totalorder %s996_s23, 0 }
  0x6d   : > { %679 = dma.done.wait (%p1007_p1), [#allocation6], 256  }
  0x6e   : > { %681 = vsyncadd (%p1007_p1), [#allocation6], 4294967040  ;;  %v286_v0 = vld [vmem:[%s245_s30] sm:$0xff]  ;;  %s713_s27 = smov 127   ;;  %s714_s10 = smov 1   ;;  %v291_v1 = vld [vmem:[#allocation5] sm:$0xff] }
  0x6f   : > { %287 = vrot.lane.b32.xlu0 %v286_v0, %s713_s27  ;;  %v293_v2 = vld [vmem:[#allocation7] sm:$0xff]  ;;  %v292_v4 = vmul.f32 %v291_v1, %v286_v0  ;;  %v296_v6 = vld [vmem:[%s990_s3] sm:$0xff]  ;;  %s448_s23 = sshll.u32 %s700_s18, 7  ;;  %s281_s29 = scalar_lea.vmem [#allocation8], %s443_s22 }
  0x70   : > { %s315_s12 = sshll.u32 %s281_s29, 4  ;;  %s938_s9 = scalar_lea.hbm %s991_s4, %s448_s23  ;;  %s940_s12 = int_to_ptr.vmem [resolvable:$true] %s315_s12 }
  0x71   : > { %s301_s24 = scalar_lea.sflag [#allocation4], %s919_s13  ;;  %s622_s21 = scalar_lea.vmem %s940_s12, 128 }
  0x72   : > { %p623_p11 = scmp.ne.s32.totalorder %s940_s12, %s622_s21  ;;  %s715_s18 = smov [#allocation8]  }
  0x73   : > { %289 = vrot.lane.b32.xlu0 %v286_v0, %s714_s10  ;;  %s626_s22 = sshll.u32 %s715_s18, 4  ;;  %s627_s22 = int_to_ptr.vmem [resolvable:$false] %s626_s22 }
  0x74   : > { %p624_p4 = pnand %p623_p11, %p867_p8  ;;  %s628_s5 = scalar_lea.vmem %s627_s22, 256 }
  0x75   : > { %p629_p6 = scmp.lt.s32.totalorder %s940_s12, %s627_s22  ;;  %p630_p12 = scmp.lt.s32.totalorder %s628_s5, %s622_s21 }
  0x76   : > { %p625_p2 = pneg %p624_p4 }
  0x77   : > { %p631_p0 = por %p630_p12, %p629_p6 }
  0x79   : > { %p632_p5 = pnand %p631_p0, %p625_p2 }
  0xe1   : > { %v288_v3 = vpop.permute.xlu0 %287 }
  0xe2   : > { %v294_v5 = vmul.f32 %v293_v2, %v288_v3 }
  0xe4   : > { %v295_v8 = vadd.f32 %v294_v5, %v292_v4 }
  0xe5   : > { %v290_v7 = vpop.permute.xlu0 %289 }
  0xe6   : > { %v297_v9 = vmul.f32 %v296_v6, %v290_v7 }
  0xe8   : > { %v298_v10 = vadd.f32 %v297_v9, %v295_v8 }
  0xea   : > { %299 = vst [vmem:[%s281_s29] sm:$0xff] %v298_v10 }
  0xeb   : > { %635 = shalt.err (!%p632_p5)
}
  0xec   : > { %s636_s13 = scalar_lea.hbm %s938_s9, 128  ;;  %s640_s10 = scalar_lea.hbm %s991_s4, 256 }
  0xed   : > { %p637_p10 = scmp.ne.s32.totalorder %s938_s9, %s636_s13  ;;  %p641_p7 = scmp.lt.u32.totalorder %s938_s9, %s991_s4 }
  0xee   : > { %p642_p3 = scmp.lt.u32.totalorder %s640_s10, %s636_s13  ;;  %p644_p11 = scmp.lt.u32.totalorder %s636_s13, %s938_s9 }
  0xef   : > { %p638_p13 = pnand %p637_p10, %p867_p8 }
  0xf0   : > { %p643_p1 = por %p642_p3, %p641_p7 }
  0xf1   : > { %p639_p9 = pneg %p638_p13 }
  0xf2   : > { %p645_p4 = por %p644_p11, %p643_p1 }
  0xf4   : > { %p646_p2 = pnand %p645_p4, %p639_p9 }
  0xf6   : > { %649 = shalt.err (!%p646_p2)
}
  0xf7   : > { %461 = dma.vmem_to_hbm [thread:$0]  (%p867_p8), %s940_s12, 128, %s938_s9, %s301_s24  }
  0xf8 PF: > { %s327_s23 = sand.u32 1, %s688_s15   ;;  %p1008_p6 = scmp.ne.s32.totalorder %s999_s26, 0 }
  0xf9   : > { %p1009_p12 = scmp.ge.s32.totalorder %s708_s20, 2  ;;  %s328_s29 = scalar_lea.sflag [#allocation4], %s327_s23 }
  0xfb   : > { %p475_p0 = pnand %p1009_p12, %p1008_p6 }
  0xfd   : > { %683 = dma.done.wait (!%p475_p0), %s328_s29, 128  }
  0xfe   : > { %685 = vsyncadd (!%p475_p0), %s328_s29, 4294967168  ;;  %s21_s20 = sadd.s32 1, %s708_s20   ;;  %s1010_s15 = smov %s692_s16 }
  0xff   : > { %p18_p5 = scmp.ge.s32.totalorder %s21_s20, 4   ;;  %s1011_s16 = smov %s696_s17 }
 0x100   : > { %s1012_s17 = smov %s876_s7  ;;  %s1013_s18 = smov %s704_s19 }
 0x101   : > { %s1014_s19 = smov %s1016_s14  ;;  %20 = sbr.rel (!%p18_p5) target bundleno = 7 (0x7), region = 94 }
 0x108   :  { %333 = vsyncpa [#allocation3], 1 }
 0x109   :  { %335 = vsyncpa [#allocation3 + $0x1], 1 }
 0x10a   :  { %336 = vsyncpa [#allocation6], 1 }
 0x10b   :  { %337 = vsyncpa [#allocation4], 1 }
 0x10c   :  { %339 = vsyncpa [#allocation4 + $0x1], 1 }

</bundles_post_ra>
